<compile_context>
chip_gen: v5e
topology: v5e:2x2
jax: 0.10.0
libtpu: 0.0.40
codegen_flags: <defaults>
</compile_context>

<pallas_src>
import functools

import jax
import jax.numpy as jnp
from jax import lax
from jax.experimental import pallas as pl
from jax.experimental.pallas import tpu as pltpu

EPS = 1e-8  # matches nn.GroupNorm(..., eps=1e-08) in the module


def _depthconv_kernel(x_ref, w1_ref, wd_ref, wr_ref, cpk_ref, hpk_ref,
                      seg_ref, segt_ref, mask_ref, slope_ref, out_ref,
                      *, kernel_size, padding, dilation, t_len):
    x = x_ref[0]                       # (C, L) bf16, L = Bb*T (lane-dense)
    C, L = x.shape
    H = hpk_ref.shape[0]

    # packed per-channel params (f32)
    b1 = cpk_ref[:, 0:1]
    g1 = cpk_ref[:, 1:2]
    be1 = cpk_ref[:, 2:3]
    br = cpk_ref[:, 3:4]
    bd = hpk_ref[:, 0:1]
    g2 = hpk_ref[:, 1:2]
    be2 = hpk_ref[:, 2:3]
    a1 = slope_ref[0]                  # PReLU slopes (scalars in SMEM)
    a2 = slope_ref[1]
    seg = seg_ref[...]                 # (L, Bb)  per-sample segment one-hot
    segt = segt_ref[...]               # (Bb, L)

    # ---- conv1d (1x1 pointwise): (C,C)@(C,L) on MXU, bf16 in / f32 acc ----
    h = jnp.dot(w1_ref[...], x, preferred_element_type=jnp.float32) + b1

    # ---- PReLU (single shared slope, PyTorch default num_parameters=1) ----
    h = jnp.where(h >= 0, h, a1 * h)
    # Dropout2d: identity at inference (eval mode)

    # ---- GroupNorm(1, C): per-sample stats via one MXU segment reduction ----
    inv_n1 = 1.0 / float(C * t_len)
    st = jnp.dot(jnp.concatenate([h, h * h], axis=0), seg,
                 preferred_element_type=jnp.float32)             # (2C, Bb)
    mean = jnp.sum(st[:C], axis=0, keepdims=True) * inv_n1        # (1, Bb)
    var = jnp.maximum(jnp.sum(st[C:], axis=0, keepdims=True) * inv_n1
                      - mean * mean, 0.0)
    inv = lax.rsqrt(var + EPS)
    mean_l = jnp.dot(mean, segt, preferred_element_type=jnp.float32)  # (1, L)
    inv_l = jnp.dot(inv, segt, preferred_element_type=jnp.float32)    # (1, L)
    h = (h - mean_l) * inv_l * g1 + be1

    # ---- grouped dilated conv1d as K block-diagonal dense matmuls ----
    # per-sample zero padding realised as lane roll (XLU) * precomputed mask;
    # the zero-offset tap needs neither.
    acc = None
    for k in range(kernel_size):
        off = k * dilation - padding               # input time index = t + off
        if off == 0:
            tap = h.astype(jnp.bfloat16)
        else:
            shift = (-off) % L
            tap = (pltpu.roll(h, shift=shift, axis=1)
                   * mask_ref[k]).astype(jnp.bfloat16)
        contrib = jnp.dot(wd_ref[k], tap, preferred_element_type=jnp.float32)
        acc = contrib if acc is None else acc + contrib
    acc = acc + bd

    # ---- PReLU ----
    h2 = jnp.where(acc >= 0, acc, a2 * acc)
    # Dropout2d: identity at inference (eval mode)

    # ---- GroupNorm(1, H) ----
    inv_n2 = 1.0 / float(H * t_len)
    st2 = jnp.dot(jnp.concatenate([h2, h2 * h2], axis=0), seg,
                  preferred_element_type=jnp.float32)            # (2H, Bb)
    mean2 = jnp.sum(st2[:H], axis=0, keepdims=True) * inv_n2
    var2 = jnp.maximum(jnp.sum(st2[H:], axis=0, keepdims=True) * inv_n2
                       - mean2 * mean2, 0.0)
    inv2 = lax.rsqrt(var2 + EPS)
    mean2_l = jnp.dot(mean2, segt, preferred_element_type=jnp.float32)
    inv2_l = jnp.dot(inv2, segt, preferred_element_type=jnp.float32)
    h2 = (h2 - mean2_l) * inv2_l * g2 + be2

    # ---- res_out (1x1 pointwise): (C,H)@(H,L) ----
    res = jnp.dot(wr_ref[...], h2.astype(jnp.bfloat16),
                  preferred_element_type=jnp.float32) + br
    out_ref[0] = res.astype(out_ref.dtype)


def depthconv1d_forward(x, params, *, kernel_size, padding, dilation):
    f32 = jnp.float32
    B, C, T = x.shape
    H = params["bd"].shape[0]
    K = kernel_size

    # --- batch folding: Bb samples per grid step, lanes = Bb*T (>=128 dense) ---
    Bb = max(1, 128 // T) if T < 128 else 1
    L = Bb * T
    Bp = ((B + Bb - 1) // Bb) * Bb
    if Bp != B:
        x = jnp.pad(x, ((0, Bp - B), (0, 0), (0, 0)))
    G = Bp // Bb

    # (Bp,C,T) -> (G, C, Bb*T): sample j of a group occupies lanes [j*T, (j+1)*T)
    xg = (x.reshape(G, Bb, C, T)
            .transpose(0, 2, 1, 3)
            .reshape(G, C, L)).astype(jnp.bfloat16)

    # --- weights to bf16 (MXU operands), per-channel params packed in f32 ---
    w1 = params["w1"].astype(jnp.bfloat16)                 # (C, C)
    wd = params["wd_full"].astype(jnp.bfloat16)            # (K, H, C)
    wr = params["wr"].astype(jnp.bfloat16)                 # (C, H)
    cpack = jnp.stack([params["b1"], params["g1"],
                       params["be1"], params["br"]], axis=1).astype(f32)  # (C,4)
    hpack = jnp.stack([params["bd"], params["g2"],
                       params["be2"]], axis=1).astype(f32)                # (H,3)
    slopes = jnp.concatenate([jnp.ravel(params["a1"]),
                              jnp.ravel(params["a2"])]).astype(f32)       # (2,)

    # --- segment matrices (per-sample reductions / broadcasts) and tap masks ---
    lane = jnp.arange(L)
    seg = (lane[:, None] // T == jnp.arange(Bb)[None, :]).astype(f32)     # (L,Bb)
    segt = seg.T                                                           # (Bb,L)
    tmod = lane % T
    mask = jnp.stack(
        [((tmod + (k * dilation - padding) >= 0) &
          (tmod + (k * dilation - padding) < T)).astype(f32)
         for k in range(K)])[:, None, :]                                   # (K,1,L)

    kernel = functools.partial(_depthconv_kernel, kernel_size=K,
                               padding=padding, dilation=dilation, t_len=T)

    def rep(shape):
        nd = len(shape)
        return pl.BlockSpec(shape, lambda *idx: (0,) * nd)

    grid_spec = pltpu.PrefetchScalarGridSpec(
        num_scalar_prefetch=0,
        grid=(G,),
        in_specs=[
            pl.BlockSpec((1, C, L), lambda g: (g, 0, 0)),   # x  (bf16)
            rep((C, C)),                                    # conv1d weight
            rep((K, H, C)),                                 # dconv weight (per tap)
            rep((C, H)),                                    # res_out weight
            rep((C, 4)),                                    # [b1, g1, be1, br]
            rep((H, 3)),                                    # [bd, g2, be2]
            rep((L, Bb)),                                   # segment one-hot
            rep((Bb, L)),                                   # its transpose
            rep((K, 1, L)),                                 # per-tap padding masks
            pl.BlockSpec(memory_space=pltpu.MemorySpace.SMEM),  # PReLU slopes
        ],
        out_specs=pl.BlockSpec((1, C, L), lambda g: (g, 0, 0)),
    )

    # --- explicit VMEM budget (fits v5e/v6e 128 MiB and v7x 64 MiB scoped) ---
    bf2, f4 = 2, 4
    est = (2 * (C * L * bf2 + C * L * f4)                      # 2-deep in/out blocks
           + (C * C + K * H * C + C * H) * bf2                 # weights (resident)
           + (C * 4 + H * 3 + 2 * L * Bb + K * L) * f4         # params / seg / masks
           + (10 * C * L + 6 * H * L) * f4)                    # f32 temps headroom
    vmem_limit = int(min(32 * 1024 * 1024, max(4 * 1024 * 1024, 4 * est)))

    out = pl.pallas_call(
        kernel,
        out_shape=jax.ShapeDtypeStruct((G, C, L), jnp.float32),
        grid_spec=grid_spec,
        compiler_params=pltpu.CompilerParams(
            dimension_semantics=("parallel",),
            vmem_limit_bytes=vmem_limit),
    )(xg, w1, wd, wr, cpack, hpack, seg, segt, mask, slopes)

    # un-fold the batch
    out = (out.reshape(G, C, Bb, T)
              .transpose(0, 2, 1, 3)
              .reshape(Bp, C, T))[:B]
    return out


if __name__ == "__main__":
    # DepthConv1d(input_channel=8, hidden_channel=16, kernel=3, padding=1)
    # B=16 so that 8 samples fold into 128 lanes and the grid has 2 parallel steps.
    B, C, H, T = 16, 8, 16, 16
    K, PAD, DIL = 3, 1, 1
    Gr = H // 4                      # groups = hidden_channel / 4
    f32 = jnp.float32

    key = jax.random.PRNGKey(0)
    ks = jax.random.split(key, 11)
    W1 = jax.random.normal(ks[0], (C, C), f32) * 0.3
    b1 = jax.random.normal(ks[1], (C,), f32) * 0.1
    Wd = jax.random.normal(ks[2], (H, C // Gr, K), f32) * 0.3   # grouped conv (O, I/G, K)
    bd = jax.random.normal(ks[3], (H,), f32) * 0.1
    Wr = jax.random.normal(ks[4], (C, H), f32) * 0.3
    br = jax.random.normal(ks[5], (C,), f32) * 0.1
    g1 = 1.0 + 0.1 * jax.random.normal(ks[6], (C,), f32)
    be1 = 0.1 * jax.random.normal(ks[7], (C,), f32)
    g2 = 1.0 + 0.1 * jax.random.normal(ks[8], (H,), f32)
    be2 = 0.1 * jax.random.normal(ks[9], (H,), f32)
    a1 = jnp.asarray(0.25, f32)          # PyTorch PReLU default init
    a2 = jnp.asarray(0.25, f32)
    x = jax.random.normal(ks[10], (B, C, T), f32)

    # Dense block-diagonal form of the grouped conv weight: one (H, C) matrix per tap.
    cin_g, cout_g = C // Gr, H // Gr
    Wd_full = jnp.zeros((K, H, C), f32)
    for o in range(H):
        g = o // cout_g
        Wd_full = Wd_full.at[:, o, g * cin_g:(g + 1) * cin_g].set(Wd[o].T)

    params = dict(w1=W1, b1=b1, g1=g1, be1=be1, wd_full=Wd_full, bd=bd,
                  g2=g2, be2=be2, wr=Wr, br=br, a1=a1, a2=a2)

    fwd = jax.jit(functools.partial(depthconv1d_forward,
                                    kernel_size=K, padding=PAD, dilation=DIL))
    out = jax.block_until_ready(fwd(x, params))

    # Pure-JAX reference (f32, independent of the kernel's block-diag trick).
    def reference(xin):
        h = jnp.einsum('oi,bit->bot', W1, xin, precision='highest') + b1[None, :, None]
        h = jnp.where(h >= 0, h, a1 * h)
        m = h.mean(axis=(1, 2), keepdims=True)
        v = ((h - m) ** 2).mean(axis=(1, 2), keepdims=True)
        h = (h - m) / jnp.sqrt(v + EPS) * g1[None, :, None] + be1[None, :, None]
        h2 = lax.conv_general_dilated(
            h, Wd, window_strides=(1,), padding=[(PAD, PAD)], rhs_dilation=(DIL,),
            dimension_numbers=('NCH', 'OIH', 'NCH'), feature_group_count=Gr,
            precision=lax.Precision.HIGHEST) + bd[None, :, None]
        h2 = jnp.where(h2 >= 0, h2, a2 * h2)
        m2 = h2.mean(axis=(1, 2), keepdims=True)
        v2 = ((h2 - m2) ** 2).mean(axis=(1, 2), keepdims=True)
        h2 = (h2 - m2) / jnp.sqrt(v2 + EPS) * g2[None, :, None] + be2[None, :, None]
        return jnp.einsum('oi,bit->bot', Wr, h2, precision='highest') + br[None, :, None]

    ref = reference(x)
    assert out.shape == (B, C, T)
    max_err = float(jnp.max(jnp.abs(out - ref)))
    mean_err = float(jnp.mean(jnp.abs(out - ref)))
    # Tolerances account for bf16 MXU operands vs. the f32-highest reference.
    assert max_err < 6e-2 and mean_err < 2e-2, f"max_err={max_err} mean_err={mean_err}"
    print("KERNEL_OK")
</pallas_src>

<mosaic_0001>
module attributes {stable_mosaic.version = 11 : i64} {
  func.func @_depthconv_kernel(%arg0: i32, %arg1: memref<1x8x128xbf16, #tpu.memory_space<vmem>>, %arg2: memref<8x8xbf16, #tpu.memory_space<vmem>>, %arg3: memref<3x16x8xbf16, #tpu.memory_space<vmem>>, %arg4: memref<8x16xbf16, #tpu.memory_space<vmem>>, %arg5: memref<8x4xf32, #tpu.memory_space<vmem>>, %arg6: memref<16x3xf32, #tpu.memory_space<vmem>>, %arg7: memref<128x8xf32, #tpu.memory_space<vmem>>, %arg8: memref<8x128xf32, #tpu.memory_space<vmem>>, %arg9: memref<3x1x128xf32, #tpu.memory_space<vmem>>, %arg10: memref<2xf32, #tpu.memory_space<smem>>, %arg11: memref<1x8x128xf32, #tpu.memory_space<vmem>>) attributes {dimension_semantics = [#tpu.dimension_semantics<parallel>], iteration_bounds = array<i64: 2>, scalar_prefetch = 0 : i64, scratch_operands = 0 : i64, tpu.core_type = #tpu.core_type<tc>, window_params = [{transform_indices = @transform_0, window_bounds = array<i64: 1, 8, 128>}, {pipeline_mode = #tpu.pipeline_mode<synchronous>, transform_indices = @transform_1, window_bounds = array<i64: 8, 8>}, {pipeline_mode = #tpu.pipeline_mode<synchronous>, transform_indices = @transform_2, window_bounds = array<i64: 3, 16, 8>}, {pipeline_mode = #tpu.pipeline_mode<synchronous>, transform_indices = @transform_3, window_bounds = array<i64: 8, 16>}, {pipeline_mode = #tpu.pipeline_mode<synchronous>, transform_indices = @transform_4, window_bounds = array<i64: 8, 4>}, {pipeline_mode = #tpu.pipeline_mode<synchronous>, transform_indices = @transform_5, window_bounds = array<i64: 16, 3>}, {pipeline_mode = #tpu.pipeline_mode<synchronous>, transform_indices = @transform_6, window_bounds = array<i64: 128, 8>}, {pipeline_mode = #tpu.pipeline_mode<synchronous>, transform_indices = @transform_7, window_bounds = array<i64: 8, 128>}, {pipeline_mode = #tpu.pipeline_mode<synchronous>, transform_indices = @transform_8, window_bounds = array<i64: 3, 1, 128>}, {transform_indices = @transform_9, window_bounds = array<i64: 2>}, {transform_indices = @transform_10, window_bounds = array<i64: 1, 8, 128>}]} {
    %c0 = arith.constant 0 : index
    %c0_0 = arith.constant 0 : index
    %c0_1 = arith.constant 0 : index
    %0 = vector.load %arg1[%c0, %c0_0, %c0_1] : memref<1x8x128xbf16, #tpu.memory_space<vmem>>, vector<1x8x128xbf16>
    %1 = vector.shape_cast %0 : vector<1x8x128xbf16> to vector<8x128xbf16>
    %c0_2 = arith.constant 0 : index
    %c0_3 = arith.constant 0 : index
    %2 = vector.load %arg5[%c0_2, %c0_3] : memref<8x4xf32, #tpu.memory_space<vmem>>, vector<8x1xf32>
    %c0_4 = arith.constant 0 : index
    %c1 = arith.constant 1 : index
    %3 = vector.load %arg5[%c0_4, %c1] : memref<8x4xf32, #tpu.memory_space<vmem>>, vector<8x1xf32>
    %c0_5 = arith.constant 0 : index
    %c2 = arith.constant 2 : index
    %4 = vector.load %arg5[%c0_5, %c2] : memref<8x4xf32, #tpu.memory_space<vmem>>, vector<8x1xf32>
    %c0_6 = arith.constant 0 : index
    %c3 = arith.constant 3 : index
    %5 = vector.load %arg5[%c0_6, %c3] : memref<8x4xf32, #tpu.memory_space<vmem>>, vector<8x1xf32>
    %c0_7 = arith.constant 0 : index
    %c0_8 = arith.constant 0 : index
    %6 = vector.load %arg6[%c0_7, %c0_8] : memref<16x3xf32, #tpu.memory_space<vmem>>, vector<16x1xf32>
    %c0_9 = arith.constant 0 : index
    %c1_10 = arith.constant 1 : index
    %7 = vector.load %arg6[%c0_9, %c1_10] : memref<16x3xf32, #tpu.memory_space<vmem>>, vector<16x1xf32>
    %c0_11 = arith.constant 0 : index
    %c2_12 = arith.constant 2 : index
    %8 = vector.load %arg6[%c0_11, %c2_12] : memref<16x3xf32, #tpu.memory_space<vmem>>, vector<16x1xf32>
    %c0_13 = arith.constant 0 : index
    %9 = memref.load %arg10[%c0_13] : memref<2xf32, #tpu.memory_space<smem>>
    %c1_14 = arith.constant 1 : index
    %10 = memref.load %arg10[%c1_14] : memref<2xf32, #tpu.memory_space<smem>>
    %c0_15 = arith.constant 0 : index
    %c0_16 = arith.constant 0 : index
    %11 = vector.load %arg7[%c0_15, %c0_16] : memref<128x8xf32, #tpu.memory_space<vmem>>, vector<128x8xf32>
    %c0_17 = arith.constant 0 : index
    %c0_18 = arith.constant 0 : index
    %12 = vector.load %arg8[%c0_17, %c0_18] : memref<8x128xf32, #tpu.memory_space<vmem>>, vector<8x128xf32>
    %c0_19 = arith.constant 0 : index
    %c0_20 = arith.constant 0 : index
    %13 = vector.load %arg2[%c0_19, %c0_20] : memref<8x8xbf16, #tpu.memory_space<vmem>>, vector<8x8xbf16>
    %cst = arith.constant dense<0.000000e+00> : vector<8x128xf32>
    %14 = tpu.matmul %13, %1, %cst {dimension_numbers = #tpu.dot_dimension_numbers<[1], [0], [0], [1], [0, 0, 1, 1], [], []>} : vector<8x8xbf16>, vector<8x128xbf16>, vector<8x128xf32> -> vector<8x128xf32>
    %15 = vector.broadcast %2 : vector<8x1xf32> to vector<8x128xf32>
    %16 = arith.addf %14, %15 : vector<8x128xf32>
    %cst_21 = arith.constant 0.000000e+00 : f32
    %17 = vector.broadcast %cst_21 : f32 to vector<8x128xf32>
    %18 = arith.cmpf oge, %16, %17 : vector<8x128xf32>
    %19 = vector.broadcast %9 : f32 to vector<8x128xf32>
    %20 = arith.mulf %19, %16 : vector<8x128xf32>
    %21 = arith.select %18, %16, %20 : vector<8x128xi1>, vector<8x128xf32>
    %22 = arith.mulf %21, %21 : vector<8x128xf32>
    %23 = tpu.concatenate %21, %22 in 0 : vector<8x128xf32>, vector<8x128xf32> -> vector<16x128xf32>
    %cst_22 = arith.constant dense<0.000000e+00> : vector<16x8xf32>
    %24 = tpu.matmul %23, %11, %cst_22 {dimension_numbers = #tpu.dot_dimension_numbers<[1], [0], [0], [1], [0, 0, 1, 1], [], []>} : vector<16x128xf32>, vector<128x8xf32>, vector<16x8xf32> -> vector<16x8xf32>
    %25 = vector.extract_strided_slice %24 {offsets = [0, 0], sizes = [8, 8], strides = [1, 1]} : vector<16x8xf32> to vector<8x8xf32>
    %cst_23 = arith.constant dense<0.000000e+00> : vector<8xf32>
    %26 = vector.multi_reduction <add>, %25, %cst_23 [0] : vector<8x8xf32> to vector<8xf32>
    %27 = vector.shape_cast %26 : vector<8xf32> to vector<1x8xf32>
    %cst_24 = arith.constant 7.812500e-03 : f32
    %28 = vector.broadcast %cst_24 : f32 to vector<1x8xf32>
    %29 = arith.mulf %27, %28 : vector<1x8xf32>
    %30 = vector.extract_strided_slice %24 {offsets = [8, 0], sizes = [8, 8], strides = [1, 1]} : vector<16x8xf32> to vector<8x8xf32>
    %cst_25 = arith.constant dense<0.000000e+00> : vector<8xf32>
    %31 = vector.multi_reduction <add>, %30, %cst_25 [0] : vector<8x8xf32> to vector<8xf32>
    %32 = vector.shape_cast %31 : vector<8xf32> to vector<1x8xf32>
    %cst_26 = arith.constant 7.812500e-03 : f32
    %33 = vector.broadcast %cst_26 : f32 to vector<1x8xf32>
    %34 = arith.mulf %32, %33 : vector<1x8xf32>
    %35 = arith.mulf %29, %29 : vector<1x8xf32>
    %36 = arith.subf %34, %35 : vector<1x8xf32>
    %cst_27 = arith.constant 0.000000e+00 : f32
    %37 = vector.broadcast %cst_27 : f32 to vector<1x8xf32>
    %38 = arith.maximumf %36, %37 : vector<1x8xf32>
    %cst_28 = arith.constant 9.99999993E-9 : f32
    %39 = vector.broadcast %cst_28 : f32 to vector<1x8xf32>
    %40 = arith.addf %38, %39 : vector<1x8xf32>
    %41 = math.rsqrt %40 : vector<1x8xf32>
    %cst_29 = arith.constant dense<0.000000e+00> : vector<1x128xf32>
    %42 = tpu.matmul %29, %12, %cst_29 {dimension_numbers = #tpu.dot_dimension_numbers<[1], [0], [0], [1], [0, 0, 1, 1], [], []>} : vector<1x8xf32>, vector<8x128xf32>, vector<1x128xf32> -> vector<1x128xf32>
    %cst_30 = arith.constant dense<0.000000e+00> : vector<1x128xf32>
    %43 = tpu.matmul %41, %12, %cst_30 {dimension_numbers = #tpu.dot_dimension_numbers<[1], [0], [0], [1], [0, 0, 1, 1], [], []>} : vector<1x8xf32>, vector<8x128xf32>, vector<1x128xf32> -> vector<1x128xf32>
    %44 = vector.broadcast %42 : vector<1x128xf32> to vector<8x128xf32>
    %45 = arith.subf %21, %44 : vector<8x128xf32>
    %46 = vector.broadcast %43 : vector<1x128xf32> to vector<8x128xf32>
    %47 = arith.mulf %45, %46 : vector<8x128xf32>
    %48 = vector.broadcast %3 : vector<8x1xf32> to vector<8x128xf32>
    %49 = arith.mulf %47, %48 : vector<8x128xf32>
    %50 = vector.broadcast %4 : vector<8x1xf32> to vector<8x128xf32>
    %51 = arith.addf %49, %50 : vector<8x128xf32>
    %c1_i32 = arith.constant 1 : i32
    %52 = tpu.dynamic_rotate %51 by %c1_i32 dim 1 : vector<8x128xf32>, i32 -> vector<8x128xf32>
    %c0_31 = arith.constant 0 : index
    %c0_32 = arith.constant 0 : index
    %c0_33 = arith.constant 0 : index
    %53 = vector.load %arg9[%c0_31, %c0_32, %c0_33] : memref<3x1x128xf32, #tpu.memory_space<vmem>>, vector<1x1x128xf32>
    %54 = vector.shape_cast %53 : vector<1x1x128xf32> to vector<1x128xf32>
    %55 = vector.broadcast %54 : vector<1x128xf32> to vector<8x128xf32>
    %56 = arith.mulf %52, %55 : vector<8x128xf32>
    %57 = arith.truncf %56 : vector<8x128xf32> to vector<8x128xbf16>
    %c0_34 = arith.constant 0 : index
    %c0_35 = arith.constant 0 : index
    %c0_36 = arith.constant 0 : index
    %58 = vector.load %arg3[%c0_34, %c0_35, %c0_36] : memref<3x16x8xbf16, #tpu.memory_space<vmem>>, vector<1x16x8xbf16>
    %59 = vector.shape_cast %58 : vector<1x16x8xbf16> to vector<16x8xbf16>
    %cst_37 = arith.constant dense<0.000000e+00> : vector<16x128xf32>
    %60 = tpu.matmul %59, %57, %cst_37 {dimension_numbers = #tpu.dot_dimension_numbers<[1], [0], [0], [1], [0, 0, 1, 1], [], []>} : vector<16x8xbf16>, vector<8x128xbf16>, vector<16x128xf32> -> vector<16x128xf32>
    %61 = arith.truncf %51 : vector<8x128xf32> to vector<8x128xbf16>
    %c1_38 = arith.constant 1 : index
    %c0_39 = arith.constant 0 : index
    %c0_40 = arith.constant 0 : index
    %62 = vector.load %arg3[%c1_38, %c0_39, %c0_40] : memref<3x16x8xbf16, #tpu.memory_space<vmem>>, vector<1x16x8xbf16>
    %63 = vector.shape_cast %62 : vector<1x16x8xbf16> to vector<16x8xbf16>
    %cst_41 = arith.constant dense<0.000000e+00> : vector<16x128xf32>
    %64 = tpu.matmul %63, %61, %cst_41 {dimension_numbers = #tpu.dot_dimension_numbers<[1], [0], [0], [1], [0, 0, 1, 1], [], []>} : vector<16x8xbf16>, vector<8x128xbf16>, vector<16x128xf32> -> vector<16x128xf32>
    %65 = arith.addf %60, %64 : vector<16x128xf32>
    %c127_i32 = arith.constant 127 : i32
    %66 = tpu.dynamic_rotate %51 by %c127_i32 dim 1 : vector<8x128xf32>, i32 -> vector<8x128xf32>
    %c2_42 = arith.constant 2 : index
    %c0_43 = arith.constant 0 : index
    %c0_44 = arith.constant 0 : index
    %67 = vector.load %arg9[%c2_42, %c0_43, %c0_44] : memref<3x1x128xf32, #tpu.memory_space<vmem>>, vector<1x1x128xf32>
    %68 = vector.shape_cast %67 : vector<1x1x128xf32> to vector<1x128xf32>
    %69 = vector.broadcast %68 : vector<1x128xf32> to vector<8x128xf32>
    %70 = arith.mulf %66, %69 : vector<8x128xf32>
    %71 = arith.truncf %70 : vector<8x128xf32> to vector<8x128xbf16>
    %c2_45 = arith.constant 2 : index
    %c0_46 = arith.constant 0 : index
    %c0_47 = arith.constant 0 : index
    %72 = vector.load %arg3[%c2_45, %c0_46, %c0_47] : memref<3x16x8xbf16, #tpu.memory_space<vmem>>, vector<1x16x8xbf16>
    %73 = vector.shape_cast %72 : vector<1x16x8xbf16> to vector<16x8xbf16>
    %cst_48 = arith.constant dense<0.000000e+00> : vector<16x128xf32>
    %74 = tpu.matmul %73, %71, %cst_48 {dimension_numbers = #tpu.dot_dimension_numbers<[1], [0], [0], [1], [0, 0, 1, 1], [], []>} : vector<16x8xbf16>, vector<8x128xbf16>, vector<16x128xf32> -> vector<16x128xf32>
    %75 = arith.addf %65, %74 : vector<16x128xf32>
    %76 = vector.broadcast %6 : vector<16x1xf32> to vector<16x128xf32>
    %77 = arith.addf %75, %76 : vector<16x128xf32>
    %cst_49 = arith.constant 0.000000e+00 : f32
    %78 = vector.broadcast %cst_49 : f32 to vector<16x128xf32>
    %79 = arith.cmpf oge, %77, %78 : vector<16x128xf32>
    %80 = vector.broadcast %10 : f32 to vector<16x128xf32>
    %81 = arith.mulf %80, %77 : vector<16x128xf32>
    %82 = arith.select %79, %77, %81 : vector<16x128xi1>, vector<16x128xf32>
    %83 = arith.mulf %82, %82 : vector<16x128xf32>
    %84 = tpu.concatenate %82, %83 in 0 : vector<16x128xf32>, vector<16x128xf32> -> vector<32x128xf32>
    %cst_50 = arith.constant dense<0.000000e+00> : vector<32x8xf32>
    %85 = tpu.matmul %84, %11, %cst_50 {dimension_numbers = #tpu.dot_dimension_numbers<[1], [0], [0], [1], [0, 0, 1, 1], [], []>} : vector<32x128xf32>, vector<128x8xf32>, vector<32x8xf32> -> vector<32x8xf32>
    %86 = vector.extract_strided_slice %85 {offsets = [0, 0], sizes = [16, 8], strides = [1, 1]} : vector<32x8xf32> to vector<16x8xf32>
    %cst_51 = arith.constant dense<0.000000e+00> : vector<8xf32>
    %87 = vector.multi_reduction <add>, %86, %cst_51 [0] : vector<16x8xf32> to vector<8xf32>
    %88 = vector.shape_cast %87 : vector<8xf32> to vector<1x8xf32>
    %cst_52 = arith.constant 3.906250e-03 : f32
    %89 = vector.broadcast %cst_52 : f32 to vector<1x8xf32>
    %90 = arith.mulf %88, %89 : vector<1x8xf32>
    %91 = vector.extract_strided_slice %85 {offsets = [16, 0], sizes = [16, 8], strides = [1, 1]} : vector<32x8xf32> to vector<16x8xf32>
    %cst_53 = arith.constant dense<0.000000e+00> : vector<8xf32>
    %92 = vector.multi_reduction <add>, %91, %cst_53 [0] : vector<16x8xf32> to vector<8xf32>
    %93 = vector.shape_cast %92 : vector<8xf32> to vector<1x8xf32>
    %cst_54 = arith.constant 3.906250e-03 : f32
    %94 = vector.broadcast %cst_54 : f32 to vector<1x8xf32>
    %95 = arith.mulf %93, %94 : vector<1x8xf32>
    %96 = arith.mulf %90, %90 : vector<1x8xf32>
    %97 = arith.subf %95, %96 : vector<1x8xf32>
    %cst_55 = arith.constant 0.000000e+00 : f32
    %98 = vector.broadcast %cst_55 : f32 to vector<1x8xf32>
    %99 = arith.maximumf %97, %98 : vector<1x8xf32>
    %cst_56 = arith.constant 9.99999993E-9 : f32
    %100 = vector.broadcast %cst_56 : f32 to vector<1x8xf32>
    %101 = arith.addf %99, %100 : vector<1x8xf32>
    %102 = math.rsqrt %101 : vector<1x8xf32>
    %cst_57 = arith.constant dense<0.000000e+00> : vector<1x128xf32>
    %103 = tpu.matmul %90, %12, %cst_57 {dimension_numbers = #tpu.dot_dimension_numbers<[1], [0], [0], [1], [0, 0, 1, 1], [], []>} : vector<1x8xf32>, vector<8x128xf32>, vector<1x128xf32> -> vector<1x128xf32>
    %cst_58 = arith.constant dense<0.000000e+00> : vector<1x128xf32>
    %104 = tpu.matmul %102, %12, %cst_58 {dimension_numbers = #tpu.dot_dimension_numbers<[1], [0], [0], [1], [0, 0, 1, 1], [], []>} : vector<1x8xf32>, vector<8x128xf32>, vector<1x128xf32> -> vector<1x128xf32>
    %105 = vector.broadcast %103 : vector<1x128xf32> to vector<16x128xf32>
    %106 = arith.subf %82, %105 : vector<16x128xf32>
    %107 = vector.broadcast %104 : vector<1x128xf32> to vector<16x128xf32>
    %108 = arith.mulf %106, %107 : vector<16x128xf32>
    %109 = vector.broadcast %7 : vector<16x1xf32> to vector<16x128xf32>
    %110 = arith.mulf %108, %109 : vector<16x128xf32>
    %111 = vector.broadcast %8 : vector<16x1xf32> to vector<16x128xf32>
    %112 = arith.addf %110, %111 : vector<16x128xf32>
    %c0_59 = arith.constant 0 : index
    %c0_60 = arith.constant 0 : index
    %113 = vector.load %arg4[%c0_59, %c0_60] : memref<8x16xbf16, #tpu.memory_space<vmem>>, vector<8x16xbf16>
    %114 = arith.truncf %112 : vector<16x128xf32> to vector<16x128xbf16>
    %cst_61 = arith.constant dense<0.000000e+00> : vector<8x128xf32>
    %115 = tpu.matmul %113, %114, %cst_61 {dimension_numbers = #tpu.dot_dimension_numbers<[1], [0], [0], [1], [0, 0, 1, 1], [], []>} : vector<8x16xbf16>, vector<16x128xbf16>, vector<8x128xf32> -> vector<8x128xf32>
    %116 = vector.broadcast %5 : vector<8x1xf32> to vector<8x128xf32>
    %117 = arith.addf %115, %116 : vector<8x128xf32>
    %c0_62 = arith.constant 0 : index
    %c0_63 = arith.constant 0 : index
    %c0_64 = arith.constant 0 : index
    %118 = vector.load %arg11[%c0_62, %c0_63, %c0_64] : memref<1x8x128xf32, #tpu.memory_space<vmem>>, vector<1x8x128xf32>
    %119 = vector.shape_cast %118 : vector<1x8x128xf32> to vector<8x128xf32>
    %120 = vector.shape_cast %117 : vector<8x128xf32> to vector<1x8x128xf32>
    tpu.vector_store %arg11[%c0_62, %c0_63, %c0_64], %120 {strides = array<i32>} : memref<1x8x128xf32, #tpu.memory_space<vmem>>, vector<1x8x128xf32>,
    return
  }
  func.func @transform_0(%arg0: i32) -> (i32, i32, i32) {
    %c0_i32 = arith.constant 0 : i32
    %c0_i32_0 = arith.constant 0 : i32
    %c0_i32_1 = arith.constant 0 : i32
    return %arg0, %c0_i32, %c0_i32_0 : i32, i32, i32
  }
  func.func @transform_1(%arg0: i32) -> (i32, i32) {
    %c0_i32 = arith.constant 0 : i32
    %c0_i32_0 = arith.constant 0 : i32
    %c0_i32_1 = arith.constant 0 : i32
    return %c0_i32, %c0_i32_0 : i32, i32
  }
  func.func @transform_2(%arg0: i32) -> (i32, i32, i32) {
    %c0_i32 = arith.constant 0 : i32
    %c0_i32_0 = arith.constant 0 : i32
    %c0_i32_1 = arith.constant 0 : i32
    %c0_i32_2 = arith.constant 0 : i32
    return %c0_i32, %c0_i32_0, %c0_i32_1 : i32, i32, i32
  }
  func.func @transform_3(%arg0: i32) -> (i32, i32) {
    %c0_i32 = arith.constant 0 : i32
    %c0_i32_0 = arith.constant 0 : i32
    %c0_i32_1 = arith.constant 0 : i32
    return %c0_i32, %c0_i32_0 : i32, i32
  }
  func.func @transform_4(%arg0: i32) -> (i32, i32) {
    %c0_i32 = arith.constant 0 : i32
    %c0_i32_0 = arith.constant 0 : i32
    %c0_i32_1 = arith.constant 0 : i32
    return %c0_i32, %c0_i32_0 : i32, i32
  }
  func.func @transform_5(%arg0: i32) -> (i32, i32) {
    %c0_i32 = arith.constant 0 : i32
    %c0_i32_0 = arith.constant 0 : i32
    %c0_i32_1 = arith.constant 0 : i32
    return %c0_i32, %c0_i32_0 : i32, i32
  }
  func.func @transform_6(%arg0: i32) -> (i32, i32) {
    %c0_i32 = arith.constant 0 : i32
    %c0_i32_0 = arith.constant 0 : i32
    %c0_i32_1 = arith.constant 0 : i32
    return %c0_i32, %c0_i32_0 : i32, i32
  }
  func.func @transform_7(%arg0: i32) -> (i32, i32) {
    %c0_i32 = arith.constant 0 : i32
    %c0_i32_0 = arith.constant 0 : i32
    %c0_i32_1 = arith.constant 0 : i32
    return %c0_i32, %c0_i32_0 : i32, i32
  }
  func.func @transform_8(%arg0: i32) -> (i32, i32, i32) {
    %c0_i32 = arith.constant 0 : i32
    %c0_i32_0 = arith.constant 0 : i32
    %c0_i32_1 = arith.constant 0 : i32
    %c0_i32_2 = arith.constant 0 : i32
    return %c0_i32, %c0_i32_0, %c0_i32_1 : i32, i32, i32
  }
  func.func @transform_9(%arg0: i32) -> i32 {
    %c0_i32 = arith.constant 0 : i32
    %c0_i32_0 = arith.constant 0 : i32
    return %c0_i32 : i32
  }
  func.func @transform_10(%arg0: i32) -> (i32, i32, i32) {
    %c0_i32 = arith.constant 0 : i32
    %c0_i32_0 = arith.constant 0 : i32
    %c0_i32_1 = arith.constant 0 : i32
    return %arg0, %c0_i32, %c0_i32_0 : i32, i32, i32
  }
}

</mosaic_0001>

<bundles_post_ra>
// kernel: depthconv1d_forward.1
= control target key start
LH: loop header
LB: loop body
LE: loop exit
PB: predicated region body
PF: predicated region fallthrough
CT: control target
= control target key end

     0   :  { %15 = vsyncpa [#allocation3], 0  ;;  %s1056_s13 = smov 0   ;;  %s1194_s0 = inlined_call_operand.vmem [shape: bf16[2,8,128], index: 0, kind: input, shape index: {}]   ;;  %s1195_s1 = inlined_call_operand.vmem [shape: bf16[8,8], index: 1, kind: input, shape index: {}]   ;;  %s1196_s2 = inlined_call_operand.vmem [shape: bf16[3,16,8], index: 2, kind: input, shape index: {}]   ;;  %s1197_s3 = inlined_call_operand.vmem [shape: bf16[8,16], index: 3, kind: input, shape index: {}]   ;;  %s1198_s4 = inlined_call_operand.vmem [shape: f32[8,4], index: 4, kind: input, shape index: {}]   ;;  %s1199_s5 = inlined_call_operand.vmem [shape: f32[16,3], index: 5, kind: input, shape index: {}]   ;;  %s1200_s6 = inlined_call_operand.vmem [shape: f32[128,8], index: 6, kind: input, shape index: {}]   ;;  %s1201_s7 = inlined_call_operand.vmem [shape: f32[8,128], index: 7, kind: input, shape index: {}]   ;;  %s1202_s8 = inlined_call_operand.vmem [shape: f32[3,1,128], index: 8, kind: input, shape index: {}]   ;;  %s1203_s9 = inlined_call_operand.vmem [shape: f32[2], index: 9, kind: input, shape index: {}]   ;;  %s1204_s10 = inlined_call_operand.vmem [shape: f32[2,8,128], index: 10, kind: output, shape index: {}]  }
   0x1 LB: > { %s886_s14 = sadd.s32 4294967295, %s992_s13   ;;  %p888_p0 = scmp.ge.s32.totalorder %s992_s13, 1  ;;  %s992_s13 = sphi %s1056_s13, %s21_s13  }
   0x2   : > { %p267_p1 = scmp.lt.s32.totalorder %s992_s13, 3  ;;  %s303_s17 = sshll.u32 %s1203_s9, 4  ;;  %s304_s17 = int_to_ptr.vmem [resolvable:$true] %s303_s17 }
   0x3   : > { %p935_p3 = scmp.eq.s32.totalorder %s886_s14, 0  ;;  %s994_s18 = smov [#allocation2]  }
   0x4   : > { %p268_p2 = pnand %p888_p0, %p267_p1 }
   0x6   : > { %p931_p4 = pneg %p268_p2  ;;  %323 = sbr.rel (%p268_p2) target bundleno = 1208 (0x4b8), region = 60 }
   0x8   : > { %p932_p5 = pnand %p935_p3, %p931_p4 }
   0xa   : > { %934 = dma.vmem_to_smem (!%p932_p5), %s304_s17, 16, %s994_s18, [#allocation3]  }
   0xb   : > { %987 = dma.done.wait (%p935_p3), [#allocation3], 16  }
   0xc   : > { %989 = vsyncadd (%p935_p3), [#allocation3], 4294967280 }
   0xd   : > { %330 = sfence }
   0xe   : > { %p361_p6 = scmp.lt.s32.totalorder %s886_s14, 1  ;;  %v995_v0 = vmov 0   ;;  %v1071_v1 = vld [vmem:[%s1198_s4] sm:$0xff]  ;;  %v391_v2 = vld [vmem:[%s1200_s6 + $0x78] sm:$0xff]  ;;  %v390_v3 = vld [vmem:[%s1200_s6 + $0x70] sm:$0xff]  ;;  %vm403_vm0 = vcmask 1043456  }
   0xf   : > { %952 = vset.pattern.permute.xlu0 %v995_v0  ;;  %955 = vset.pattern.permute.xlu2 %v995_v0  ;;  %v389_v4 = vld [vmem:[%s1200_s6 + $0x68] sm:$0xff]  ;;  %v388_v5 = vld [vmem:[%s1200_s6 + $0x60] sm:$0xff]  ;;  %v387_v8 = vld [vmem:[%s1200_s6 + $0x58] sm:$0xff]  ;;  %vm399_vm1 = vcmask 64512   ;;  %s374_s23 = sld [smem:[#allocation2]]  ;;  %v996_v45 = vmov 1  }
  0x10   : > { %s1206_s14 = smov (!%p361_p6, %s886_s14), 1  ;;  %396 = vperm.xlu0 %952, %v1071_v1   ;;  %425 = vmatpush.msra.mxu1 %v391_v2  ;;  %v393_v9 = vld [vmem:[%s1195_s1] sm:$0xf]  ;;  %v386_v10 = vld [vmem:[%s1200_s6 + $0x50] sm:$0xff]  ;;  %v385_v11 = vld [vmem:[%s1200_s6 + $0x48] sm:$0xff]  ;;  %v997_v46 = vmov 2  }
  0x11   : > { %662 = vmatpush.msra.mxu2 %v391_v2  ;;  %s893_s27 = sshll.u32 %s1206_s14, 2  ;;  %v384_v12 = vld [vmem:[%s1200_s6 + $0x40] sm:$0xff]  ;;  %v383_v13 = vld [vmem:[%s1200_s6 + $0x38] sm:$0xff]  ;;  %v382_v14 = vld [vmem:[%s1200_s6 + $0x30] sm:$0xff]  ;;  %954 = vset.pattern.permute.xlu1 %v997_v46  ;;  %s998_s28 = smov 127   ;;  %vm803_vm11 = vcmask 130048  }
  0x12   : > { %426 = vmatpush.msra.mxu1 %v390_v3  ;;  %s364_s30 = scalar_lea.vmem %s1194_s0, %s893_s27  ;;  %v381_v15 = vld [vmem:[%s1200_s6 + $0x28] sm:$0xff]  ;;  %v380_v16 = vld [vmem:[%s1200_s6 + $0x20] sm:$0xff]  ;;  %v379_v17 = vld [vmem:[%s1200_s6 + $0x18] sm:$0xff]  ;;  %534 = vperm.xlu1 %954, %v1071_v1   ;;  %s999_s29 = smov 1  }
  0x13   : > { %663 = vmatpush.msra.mxu2 %v390_v3  ;;  %v370_v6 = vld [vmem:[%s364_s30] sm:$0xf]  ;;  %v378_v18 = vld [vmem:[%s1200_s6 + $0x10] sm:$0xff]  ;;  %v377_v19 = vld [vmem:[%s1200_s6 + $0x8] sm:$0xff]  ;;  %s895_s24 = sld [smem:[#allocation2 + $0x1]]  ;;  %s894_s27 = sshll.u32 %s1206_s14, 3 }
  0x14   : > { %427 = vmatpush.msra.mxu1 %v389_v4  ;;  %v405_v7 = vsel %vm403_vm0, %v370_v6, 0  ;;  %v376_v20 = vld [vmem:[%s1200_s6] sm:$0xff]  ;;  %v373_v51 = vld [vmem:[%s1199_s5 + $0x8] sm:$0xff]  ;;  %s368_s30 = scalar_lea.vmem %s1204_s10, %s894_s27 }
  0x15   : > { %664 = vmatpush.msra.mxu2 %v389_v4  ;;  %414 = vmatpush.bf16.msra.mxu0 %v405_v7  ;;  %v421_v23 = vstv %s374_s23  ;;  %v1137_v29 = vld [vmem:[%s1201_s7] sm:$0xff] }
  0x16   : > { %428 = vmatpush.msra.mxu1 %v388_v5  ;;  %519 = vmatpush.msra.mxu3 %v1137_v29 }
  0x17   : > { %665 = vmatpush.msra.mxu2 %v388_v5 }
  0x18   : > { %429 = vmatpush.msra.mxu1 %v387_v8  ;;  %896 = vmatmul.msk.bf16.vlgmr.msra.gmra.mxu0 %vm399_vm1, %v393_v9 }
  0x19   : > { %666 = vmatpush.msra.mxu2 %v387_v8  ;;  %953 = vset.pattern.permute.xlu0 %v996_v45 }
  0x1a   : > { %430 = vmatpush.msra.mxu1 %v386_v10  ;;  %529 = vperm.xlu0 %953, %v1071_v1  }
  0x1b   : > { %667 = vmatpush.msra.mxu2 %v386_v10  ;;  %956 = vset.pattern.permute.xlu1 %v995_v0 }
  0x1c   : > { %431 = vmatpush.msra.mxu1 %v385_v11 }
  0x1d   : > { %668 = vmatpush.msra.mxu2 %v385_v11  ;;  %v925_v11 = vld [vmem:[%s1196_s2 + $0x8] sm:$0xff] }
  0x1e   : > { %432 = vmatpush.msra.mxu1 %v384_v12 }
  0x1f   : > { %669 = vmatpush.msra.mxu2 %v384_v12  ;;  %v961_v12 = vld [vmem:[%s1202_s8 + $0x2] ss:$0 sm:$0xff] }
  0x20   : > { %433 = vmatpush.msra.mxu1 %v383_v13 }
  0x21   : > { %670 = vmatpush.msra.mxu2 %v383_v13 }
  0x22   : > { %434 = vmatpush.msra.mxu1 %v382_v14  ;;  %782 = vperm.xlu0 %953, %v373_v51  }
  0x23   : > { %671 = vmatpush.msra.mxu2 %v382_v14 }
  0x24   : > { %435 = vmatpush.msra.mxu1 %v381_v15 }
  0x25   : > { %672 = vmatpush.msra.mxu2 %v381_v15  ;;  %v372_v15 = vld [vmem:[%s1199_s5] sm:$0xff] }
  0x26   : > { %436 = vmatpush.msra.mxu1 %v380_v16 }
  0x27   : > { %673 = vmatpush.msra.mxu2 %v380_v16 }
  0x28   : > { %437 = vmatpush.msra.mxu1 %v379_v17 }
  0x29   : > { %674 = vmatpush.msra.mxu2 %v379_v17 }
  0x2a   : > { %438 = vmatpush.msra.mxu1 %v378_v18 }
  0x2b   : > { %675 = vmatpush.msra.mxu2 %v378_v18  ;;  %v926_v18 = vld [vmem:[%s1196_s2 + $0x10] sm:$0xff] }
  0x2c   : > { %439 = vmatpush.msra.mxu1 %v377_v19 }
  0x2d   : > { %676 = vmatpush.msra.mxu2 %v377_v19  ;;  %v962_v19 = vld [vmem:[%s1202_s8] ss:$0 sm:$0xff] }
  0x2e   : > { %440 = vmatpush.msra.mxu1 %v376_v20 }
  0x2f   : > { %677 = vmatpush.msra.mxu2 %v376_v20 }
  0x30   : > { %496 = vmatpush.msrb.mxu1 %v1137_v29 }
  0x82   : > { %v397_v21 = vpop.permute.xlu0 %396 }
  0x84   : > { %v535_v6 = vpop.permute.xlu1 %534 }
  0x8c   : > { %v530_v5 = vpop.permute.xlu0 %529 }
  0x95   : > { %v416_v22 = vpop.f32.mrf.mxu0 }
  0x96   : > { %v417_v24 = vadd.f32 %v416_v22, %v397_v21 }
  0x98   : > { %v422_v25 = vmul.f32 %v421_v23, %v417_v24  ;;  %vm420_vm2 = vcmp.ge.f32.partialorder %v417_v24, 0.0 }
  0x9a   : > { %v423_v26 = vsel %vm420_vm2, %v417_v24, %v422_v25  ;;  %v924_v24 = vld [vmem:[%s1196_s2] sm:$0xff] }
  0x9b   : > { %441 = vmatmul.f32.vlgmr.msra.gmra.mxu1 %v423_v26  ;;  %v424_v28 = vmul.f32 %v423_v26, %v423_v26 }
  0x9d   : > { %v418_v27 = vpop.f32.mrf.mxu0 }
  0xa3   : > { %444 = vmatmul.f32.gmra.mxu1 %v424_v28 }
 0x118   : > { %v442_v30 = vpop.f32.mrf.mxu1 }
 0x119   : > { %v448_v31 = vsel %vm399_vm1, %v442_v30, 0.0 }
 0x11a   : > { %v449_v32 = vrot.slane %v448_v31, 4 }
 0x11c   : > { %v450_v33 = vadd.f32 %v449_v32, %v448_v31 }
 0x11e   : > { %v451_v34 = vrot.slane %v450_v33, 2 }
 0x120   : > { %v452_v35 = vadd.f32 %v451_v34, %v450_v33  ;;  %v445_v36 = vpop.f32.mrf.mxu1  ;;  %v655_v33 = vstv %s895_s24 }
 0x121   : > { %v456_v37 = vsel %vm399_vm1, %v445_v36, 0.0 }
 0x122   : > { %v453_v38 = vrot.slane %v452_v35, 1  ;;  %v457_v39 = vrot.slane %v456_v37, 4 }
 0x124   : > { %v454_v40 = vadd.f32 %v453_v38, %v452_v35  ;;  %v458_v41 = vadd.f32 %v457_v39, %v456_v37 }
 0x126   : > { %v455_v42 = vmul.f32 0.0078125, %v454_v40  ;;  %v459_v43 = vrot.slane %v458_v41, 2 }
 0x128   : > { %v460_v44 = vadd.f32 %v459_v43, %v458_v41  ;;  %897 = vmatmul.msk.f32.vlgmr.msrb.gmra.mxu1 %vm399_vm1, %v455_v42  ;;  %v464_v49 = vmul.f32 %v455_v42, %v455_v42 }
 0x12a   : > { %v461_v47 = vrot.slane %v460_v44, 1 }
 0x12c   : > { %v462_v48 = vadd.f32 %v461_v47, %v460_v44 }
 0x12e   : > { %v463_v50 = vmul.f32 0.0078125, %v462_v48 }
 0x130   : > { %v465_v52 = vsub.f32 %v463_v50, %v464_v49 }
 0x132   : > { %v466_v53 = vmax.f32 %v465_v52, 0.0 }
 0x134   : > { %v467_v54 = vadd.f32 1e-08, %v466_v53 }
 0x136   : > { %963 = vrsqrt.f32 %v467_v54  ;;  %vm474_vm4 = vweird.f32 %v467_v54 }
 0x13c   : > { %v964_v55 = vpop.eup %963 }
 0x13d   : > { %v469_v56 = vmul.f32 %v964_v55, %v467_v54  ;;  %vm475_vm3 = vweird.f32 %v964_v55 }
 0x13e   : > { %vm476_vm5 = vmor %vm474_vm4, %vm475_vm3 }
 0x13f   : > { %v470_v57 = vmul.f32 %v964_v55, %v469_v56 }
 0x141   : > { %v471_v58 = vmul.f32 0.5, %v470_v57 }
 0x143   : > { %v472_v59 = vsub.f32 1.5, %v471_v58 }
 0x145   : > { %v473_v60 = vmul.f32 %v964_v55, %v472_v59 }
 0x147   : > { %v477_v61 = vsel %vm476_vm5, %v964_v55, %v473_v60 }
 0x148   : > { %898 = vmatmul.msk.f32.vlgmr.msra.gmra.mxu3 %vm399_vm1, %v477_v61 }
 0x1a5   : > { %v498_v62 = vpop.f32.mrf.mxu1 }
 0x1a6   : > { %v524_v63 = vperm.slane %v498_v62, 0 }
 0x1a8   : > { %v525_v3 = vsub.f32 %v423_v26, %v524_v63 }
 0x1cb   : > { %v521_v2 = vpop.f32.mrf.mxu3 }
 0x1cc   : > { %v526_v4 = vperm.slane %v521_v2, 0 }
 0x1ce   : > { %v527_v0 = vmul.f32 %v526_v4, %v525_v3 }
 0x1d0   : > { %v532_v7 = vmul.f32 %v530_v5, %v527_v0 }
 0x1d2   : > { %v537_v8 = vadd.f32 %v535_v6, %v532_v7 }
 0x1d4   : > { %602 = vrot.lane.b32.xlu2 %v537_v8, %s998_s28  ;;  %538 = vrot.lane.b32.xlu1 %v537_v8, %s999_s29  ;;  %v548_v9 = vpack.c.bf16 %v537_v8, %v537_v8 }
 0x1d6   : > { %v561_v10 = vsel %vm403_vm0, %v548_v9, 0 }
 0x1d7   : > { %570 = vmatpush.bf16.msrb.mxu3 %v561_v10 }
 0x1da   : > { %905 = vmatmul.msk.bf16.vlgmr.msrb.gmra.mxu3 %vm399_vm1, %v925_v11 }
 0x1dc   : > { %648 = vperm.xlu1 %956, %v373_v51   ;;  %643 = vperm.xlu2 %955, %v372_v15  }
 0x1e4   : > { %958 = vset.pattern.permute.xlu1 %v997_v46  ;;  %957 = vset.pattern.permute.xlu2 %v996_v45 }
 0x1e5   : > { %788 = vperm.xlu1 %958, %v372_v15   ;;  %778 = vperm.xlu2 %957, %v372_v15  }
 0x1ed   : > { %959 = vset.pattern.permute.xlu2 %v997_v46 }
 0x1ee   : > { %792 = vperm.xlu2 %959, %v373_v51  }
 0x22e   : > { %v603_v13 = vpop.permute.xlu2 %602 }
 0x22f   : > { %v609_v14 = vmul.f32 %v961_v12, %v603_v13 }
 0x231   : > { %v610_v16 = vpack.c.bf16 %v609_v14, %v609_v14 }
 0x233   : > { %v623_v17 = vsel %vm403_vm0, %v610_v16, 0 }
 0x234   : > { %632 = vmatpush.bf16.msrb.mxu0 %v623_v17 }
 0x236   : > { %v644_v31 = vpop.permute.xlu2 %643 }
 0x237   : > { %918 = vmatmul.msk.bf16.vlgmr.msrb.gmra.mxu0 %vm399_vm1, %v926_v18  ;;  %v1000_v18 = vmov 3  }
 0x238   : > { %960 = vset.pattern.permute.xlu0 %v1000_v18 }
 0x239   : > { %800 = vperm.xlu0 %960, %v1071_v1   ;;  %v797_v1 = vld [vmem:[%s1197_s3] sm:$0xf] }
 0x246   : > { %v539_v20 = vpop.permute.xlu1 %538 }
 0x247   : > { %v544_v21 = vmul.f32 %v962_v19, %v539_v20  ;;  %v779_v20 = vpop.permute.xlu2 %778 }
 0x249   : > { %v545_v22 = vpack.c.bf16 %v544_v21, %v544_v21 }
 0x24b   : > { %v586_v23 = vsel %vm403_vm0, %v545_v22, 0 }
 0x24c   : > { %595 = vmatpush.bf16.msra.mxu3 %v586_v23 }
 0x24e   : > { %v649_v40 = vpop.permute.xlu1 %648 }
 0x24f   : > { %910 = vmatmul.msk.bf16.vlgmr.msra.gmra.mxu3 %vm399_vm1, %v924_v24 }
 0x250   : > { %743 = vmatpush.msrb.mxu3 %v1137_v29 }
 0x252   : > { %766 = vmatpush.msra.mxu3 %v1137_v29 }
 0x25d   : > { %v572_v25 = vpop.f32.mrf.mxu3 }
 0x265   : > { %v574_v26 = vpop.f32.mrf.mxu3 }
 0x2b4   : > { %v634_v27 = vpop.f32.mrf.mxu0 }
 0x2bc   : > { %v636_v39 = vpop.f32.mrf.mxu0 }
 0x2d2   : > { %v597_v28 = vpop.f32.mrf.mxu3 }
 0x2d3   : > { %v598_v30 = vadd.f32 %v597_v28, %v572_v25 }
 0x2d5   : > { %v639_v32 = vadd.f32 %v634_v27, %v598_v30  ;;  %v793_v30 = vpop.permute.xlu2 %792 }
 0x2d7   : > { %v651_v34 = vadd.f32 %v644_v31, %v639_v32  ;;  %v789_v31 = vpop.permute.xlu1 %788 }
 0x2d9   : > { %v656_v35 = vmul.f32 %v655_v33, %v651_v34  ;;  %vm653_vm6 = vcmp.ge.f32.partialorder %v651_v34, 0.0 }
 0x2da   : > { %v599_v36 = vpop.f32.mrf.mxu3 }
 0x2db   : > { %v600_v37 = vadd.f32 %v599_v36, %v574_v26  ;;  %v658_v38 = vsel %vm653_vm6, %v651_v34, %v656_v35  ;;  %v783_v26 = vpop.permute.xlu0 %782 }
 0x2dc   : > { %678 = vmatmul.f32.vlgmr.msra.gmra.mxu2 %v658_v38  ;;  %v660_v44 = vmul.f32 %v658_v38, %v658_v38 }
 0x2dd   : > { %v640_v41 = vadd.f32 %v636_v39, %v600_v37 }
 0x2df   : > { %v652_v29 = vadd.f32 %v649_v40, %v640_v41 }
 0x2e1   : > { %v657_v42 = vmul.f32 %v655_v33, %v652_v29  ;;  %vm654_vm7 = vcmp.ge.f32.partialorder %v652_v29, 0.0 }
 0x2e3   : > { %v659_v43 = vsel %vm654_vm7, %v652_v29, %v657_v42  ;;  %v801_v37 = vpop.permute.xlu0 %800 }
 0x2e4   : > { %681 = vmatmul.f32.gmra.mxu2 %v659_v43  ;;  %v661_v45 = vmul.f32 %v659_v43, %v659_v43 }
 0x2ec   : > { %684 = vmatmul.f32.gmra.mxu2 %v660_v44 }
 0x2f4   : > { %687 = vmatmul.f32.gmra.mxu2 %v661_v45 }
 0x35f   : > { %v679_v46 = vpop.f32.mrf.mxu2 }
 0x360   : > { %v691_v48 = vsel %vm399_vm1, %v679_v46, 0.0 }
 0x367   : > { %v682_v47 = vpop.f32.mrf.mxu2 }
 0x368   : > { %v692_v49 = vsel %vm399_vm1, %v682_v47, 0.0 }
 0x369   : > { %v693_v50 = vadd.f32 %v692_v49, %v691_v48 }
 0x36b   : > { %v694_v51 = vrot.slane %v693_v50, 4 }
 0x36d   : > { %v695_v52 = vadd.f32 %v694_v51, %v693_v50 }
 0x36f   : > { %v696_v53 = vrot.slane %v695_v52, 2  ;;  %v685_v54 = vpop.f32.mrf.mxu2 }
 0x370   : > { %v701_v60 = vsel %vm399_vm1, %v685_v54, 0.0 }
 0x371   : > { %v697_v55 = vadd.f32 %v696_v53, %v695_v52 }
 0x373   : > { %v698_v56 = vrot.slane %v697_v55, 1 }
 0x375   : > { %v699_v57 = vadd.f32 %v698_v56, %v697_v55 }
 0x377   : > { %v700_v58 = vmul.f32 0.00390625, %v699_v57  ;;  %v688_v59 = vpop.f32.mrf.mxu2 }
 0x378   : > { %v702_v61 = vsel %vm399_vm1, %v688_v59, 0.0 }
 0x379   : > { %v703_v62 = vadd.f32 %v702_v61, %v701_v60  ;;  %919 = vmatmul.msk.f32.vlgmr.msrb.gmra.mxu3 %vm399_vm1, %v700_v58  ;;  %v711_v6 = vmul.f32 %v700_v58, %v700_v58 }
 0x37b   : > { %v704_v63 = vrot.slane %v703_v62, 4 }
 0x37d   : > { %v705_v2 = vadd.f32 %v704_v63, %v703_v62 }
 0x37f   : > { %v706_v3 = vrot.slane %v705_v2, 2 }
 0x381   : > { %v707_v4 = vadd.f32 %v706_v3, %v705_v2 }
 0x383   : > { %v708_v0 = vrot.slane %v707_v4, 1 }
 0x385   : > { %v709_v5 = vadd.f32 %v708_v0, %v707_v4 }
 0x387   : > { %v710_v7 = vmul.f32 0.00390625, %v709_v5 }
 0x389   : > { %v712_v8 = vsub.f32 %v710_v7, %v711_v6 }
 0x38b   : > { %v713_v9 = vmax.f32 %v712_v8, 0.0 }
 0x38d   : > { %v714_v10 = vadd.f32 1e-08, %v713_v9 }
 0x38f   : > { %965 = vrsqrt.f32 %v714_v10  ;;  %vm721_vm9 = vweird.f32 %v714_v10 }
 0x395   : > { %v966_v11 = vpop.eup %965 }
 0x396   : > { %v716_v12 = vmul.f32 %v966_v11, %v714_v10  ;;  %vm722_vm8 = vweird.f32 %v966_v11 }
 0x397   : > { %vm723_vm10 = vmor %vm721_vm9, %vm722_vm8 }
 0x398   : > { %v717_v13 = vmul.f32 %v966_v11, %v716_v12 }
 0x39a   : > { %v718_v14 = vmul.f32 0.5, %v717_v13 }
 0x39c   : > { %v719_v15 = vsub.f32 1.5, %v718_v14 }
 0x39e   : > { %v720_v16 = vmul.f32 %v966_v11, %v719_v15 }
 0x3a0   : > { %v724_v17 = vsel %vm723_vm10, %v966_v11, %v720_v16 }
 0x3a1   : > { %920 = vmatmul.msk.f32.vlgmr.msra.gmra.mxu3 %vm399_vm1, %v724_v17 }
 0x3fc   : > { %v745_v19 = vpop.f32.mrf.mxu3 }
 0x3fd   : > { %v771_v21 = vperm.slane %v745_v19, 0 }
 0x3ff   : > { %v772_v23 = vsub.f32 %v658_v38, %v771_v21  ;;  %v773_v24 = vsub.f32 %v659_v43, %v771_v21 }
 0x424   : > { %v768_v22 = vpop.f32.mrf.mxu3 }
 0x425   : > { %v774_v25 = vperm.slane %v768_v22, 0 }
 0x427   : > { %v775_v27 = vmul.f32 %v774_v25, %v772_v23  ;;  %v776_v28 = vmul.f32 %v774_v25, %v773_v24 }
 0x429   : > { %v786_v32 = vmul.f32 %v783_v26, %v776_v28  ;;  %v785_v33 = vmul.f32 %v779_v20, %v775_v27 }
 0x42b   : > { %v796_v34 = vadd.f32 %v793_v30, %v786_v32  ;;  %v795_v35 = vadd.f32 %v789_v31, %v785_v33 }
 0x42d   : > { %v798_v36 = vpack.c.bf16 %v796_v34, %v795_v35 }
 0x42f   : > { %814 = vmatpush.bf16.msra.mxu0 %v798_v36 }
 0x432   : > { %921 = vmatmul.msk.bf16.vlgmr.msra.gmra.mxu0 %vm803_vm11, %v797_v1 }
 0x4af   : > { %v816_v38 = vpop.f32.mrf.mxu0 }
 0x4b0   : > { %v817_v39 = vadd.f32 %v816_v38, %v801_v37 }
 0x4b2   : > { %820 = vst [vmem:[%s368_s30] sm:$0xff] %v817_v39 }
 0x4b7   : > { %v818_v40 = vpop.f32.mrf.mxu0 }
 0x4b8 PF: > { %s21_s13 = sadd.s32 1, %s992_s13  }
 0x4b9   : > { %p18_p7 = scmp.ge.s32.totalorder %s21_s13, 4  }
 0x4bb   :  { %20 = sbr.rel (!%p18_p7) target bundleno = 1 (0x1), region = 98 }
 0x4c0   :  { %840 = vsyncpa [#allocation3], 1 }
 0x4c1   :  { %842 = vsyncpa [#allocation3 + $0x1], 1 }

</bundles_post_ra>
